<compile_context>
chip_gen: v6e
topology: v6e:2x2x1
jax: 0.10.0
libtpu: 0.0.40
codegen_flags: <defaults>
</compile_context>

<pallas_src>
import functools
from math import gcd

import jax
import jax.numpy as jnp
import numpy as np
from jax import lax
from jax.experimental import pallas as pl
from jax.experimental.pallas import tpu as pltpu


def _round_up(x, m):
    return (x + m - 1) // m * m


def _ntxent_kernel(row_ref, col_ref, out_ref, m_ref, l_ref, pos_ref, *acc,
                   block_m, block_n, n_col, n_k, n_pad, batch, batch_pad,
                   inv_temp):
    ri = pl.program_id(0)            # row-tile index ("parallel")
    ci = pl.program_id(1)            # col-tile index (reduction, "arbitrary")
    ki = pl.program_id(2) if n_k > 1 else None   # optional D-chunk index

    first_inner = (ci == 0) if n_k == 1 else ((ci == 0) & (ki == 0))
    last_inner = ((ci == n_col - 1) if n_k == 1
                  else ((ci == n_col - 1) & (ki == n_k - 1)))

    # ---- init online-LSE accumulators on the first inner step ----
    @pl.when(first_inner)
    def _():
        m_ref[...] = jnp.full_like(m_ref, -1e30)
        l_ref[...] = jnp.zeros_like(l_ref)
        pos_ref[...] = jnp.zeros_like(pos_ref)

    # Partial similarity tile on the MXU: narrow (bf16/f32) operands, f32 acc.
    # Contraction on both last dims -> no explicit transpose through the XLU.
    partial = lax.dot_general(row_ref[...], col_ref[...],
                              (((1,), (1,)), ((), ())),
                              preferred_element_type=jnp.float32)

    def update(sim):
        logits = sim * inv_temp
        r = lax.broadcasted_iota(jnp.int32, (block_m, block_n), 0) + ri * block_m
        c = lax.broadcasted_iota(jnp.int32, (block_m, block_n), 1) + ci * block_n

        # Positive logit sim[i, (i + batch_pad) mod n_pad] / T, pulled from the
        # already-computed MXU tile (exactly one match per row across all ci).
        pos_col = (r + batch_pad) % n_pad
        pos_ref[...] += jnp.sum(jnp.where(c == pos_col, logits, 0.0),
                                axis=-1, keepdims=True)

        # Self-similarity diagonal + padded-column masks folded into one where
        # on the in-register logits (no scratch store -> when -> reload).
        neg_mask = r == c
        if batch != batch_pad:
            neg_mask = neg_mask | ((c % batch_pad) >= batch)
        masked = jnp.where(neg_mask, jnp.float32(-1e30), logits)

        # ---- online logsumexp update over column tiles (f32) ----
        m_prev = m_ref[...]
        m_new = jnp.maximum(m_prev, jnp.max(masked, axis=-1, keepdims=True))
        l_ref[...] = (jnp.exp(m_prev - m_new) * l_ref[...]
                      + jnp.sum(jnp.exp(masked - m_new), axis=-1, keepdims=True))
        m_ref[...] = m_new

    if n_k == 1:
        update(partial)
    else:
        acc_ref = acc[0]

        @pl.when(ki == 0)
        def _():
            acc_ref[...] = partial

        @pl.when(ki > 0)
        def _():
            acc_ref[...] += partial

        @pl.when(ki == n_k - 1)
        def _():
            update(acc_ref[...])

    # ---- finalize this row tile on the last inner step ----
    @pl.when(last_inner)
    def _():
        per_row = m_ref[...] + jnp.log(l_ref[...]) - pos_ref[...]
        if batch != batch_pad:
            rr = lax.broadcasted_iota(jnp.int32, (block_m, 1), 0) + ri * block_m
            per_row = jnp.where((rr % batch_pad) < batch, per_row,
                                jnp.float32(0.0))
        out_ref[...] = per_row


def ntxent_loss(zis, zjs, temperature=0.5, use_cosine_similarity=True, *,
                operand_dtype=jnp.bfloat16, row_block=512, col_block=256,
                d_block=1024):
    """Pallas implementation of NTXentLoss(temperature, use_cosine_similarity)(zis, zjs).

    operand_dtype: dtype fed to the MXU (bf16 default for speed, f32 for strict
    accuracy).  All reduction / logsumexp math stays in f32 either way.
    """
    assert zis.shape == zjs.shape and zis.ndim == 2
    assert row_block % 8 == 0 and col_block % 8 == 0
    B, D = zis.shape

    # ---- tile selection ----
    n_min = 2 * _round_up(B, 8)
    if n_min <= min(row_block, col_block):
        # Tiny problem: a single tile both ways.
        B_pad = _round_up(B, 8)
        n_pad = 2 * B_pad
        block_m = block_n = n_pad
    else:
        block_m, block_n = row_block, col_block
        step = block_m * block_n // gcd(block_m, block_n)      # lcm
        if step % 2 == 0:
            step //= 2                 # only need block_m | 2*B_pad, block_n | 2*B_pad
        B_pad = _round_up(B, step)
        n_pad = 2 * B_pad
    n_row = n_pad // block_m
    n_col = n_pad // block_n

    # D (contraction) chunking - mainly for very large feature dims on v7x's
    # 64 MiB VMEM.  d_chunk must divide D and be a multiple of 128 (or == D).
    if D % 128 == 0 and D > d_block:
        d_chunk = _round_up(min(d_block, D), 128)
        while D % d_chunk:
            d_chunk -= 128
    else:
        d_chunk = D
    n_k = D // d_chunk

    # ---- wrapper-side pad + concat + (cosine) normalize + cast, done once ----
    if B_pad != B:
        pad = ((0, B_pad - B), (0, 0))
        reps = jnp.concatenate([jnp.pad(zjs, pad), jnp.pad(zis, pad)], axis=0)
    else:
        reps = jnp.concatenate([zjs, zis], axis=0)          # (n_pad, D)
    reps = reps.astype(jnp.float32)
    if use_cosine_similarity:
        # matches torch CosineSimilarity eps=1e-8: x / max(||x||, 1e-8)
        reps = reps * lax.rsqrt(
            jnp.maximum(jnp.sum(reps * reps, axis=-1, keepdims=True),
                        jnp.float32(1e-16)))
    reps = reps.astype(operand_dtype)
    # TODO(synk): feed zjs/zis as two separate HBM inputs with half-selecting
    # index_maps to drop this concat's extra HBM round trip.

    kernel = functools.partial(
        _ntxent_kernel,
        block_m=block_m, block_n=block_n, n_col=n_col, n_k=n_k, n_pad=n_pad,
        batch=B, batch_pad=B_pad,
        inv_temp=float(1.0 / float(temperature)))

    if n_k == 1:
        grid = (n_row, n_col)
        row_spec = pl.BlockSpec((block_m, d_chunk), lambda ri, ci: (ri, 0))
        col_spec = pl.BlockSpec((block_n, d_chunk), lambda ri, ci: (ci, 0))
        out_spec = pl.BlockSpec((block_m, 1), lambda ri, ci: (ri, 0))
        semantics = ("parallel", "arbitrary")
        scratch = [pltpu.VMEM((block_m, 1), jnp.float32)] * 3   # m / l / pos
    else:
        grid = (n_row, n_col, n_k)
        row_spec = pl.BlockSpec((block_m, d_chunk), lambda ri, ci, ki: (ri, ki))
        col_spec = pl.BlockSpec((block_n, d_chunk), lambda ri, ci, ki: (ci, ki))
        out_spec = pl.BlockSpec((block_m, 1), lambda ri, ci, ki: (ri, 0))
        semantics = ("parallel", "arbitrary", "arbitrary")
        scratch = ([pltpu.VMEM((block_m, 1), jnp.float32)] * 3
                   + [pltpu.VMEM((block_m, block_n), jnp.float32)])  # sim acc

    # ---- VMEM budget from the real device capacity (64 MiB fallback = v7x) ----
    op_bytes = jnp.dtype(operand_dtype).itemsize
    need = (2 * block_m * d_chunk * op_bytes        # row tile, double-buffered
            + 2 * block_n * d_chunk * op_bytes      # col tile, double-buffered
            + 2 * block_m * 128 * 4                 # out tile (lane-padded)
            + 3 * block_m * 128 * 4)                # m / l / pos accumulators
    if n_k > 1:
        need += block_m * block_n * 4
    try:
        vmem_cap = int(getattr(pltpu.get_tpu_info(), "vmem_capacity_bytes",
                               64 << 20))
    except Exception:
        vmem_cap = 64 << 20
    vmem_limit = int(min(max(2 * need, 32 << 20), max(vmem_cap - (16 << 20),
                                                      32 << 20)))
    vmem_limit = max(vmem_limit, need + (4 << 20))

    per_row = pl.pallas_call(
        kernel,
        out_shape=jax.ShapeDtypeStruct((n_pad, 1), jnp.float32),
        grid_spec=pltpu.PrefetchScalarGridSpec(
            num_scalar_prefetch=0,
            grid=grid,
            in_specs=[row_spec, col_spec],
            out_specs=out_spec,
            scratch_shapes=scratch),
        compiler_params=pltpu.CompilerParams(
            dimension_semantics=semantics,
            vmem_limit_bytes=vmem_limit),
    )(reps, reps)

    return jnp.sum(per_row) / jnp.float32(2 * B)


def _ref_ntxent_numpy(zis, zjs, temperature, use_cosine):
    """Literal numpy transcription of the torch forward, for validation."""
    zis = np.asarray(zis, np.float64)
    zjs = np.asarray(zjs, np.float64)
    b = zis.shape[0]
    n = 2 * b
    reps = np.concatenate([zjs, zis], axis=0)
    if use_cosine:
        nrm = np.maximum(np.linalg.norm(reps, axis=-1, keepdims=True), 1e-8)
        xn = reps / nrm
        sim = xn @ xn.T
    else:
        sim = reps @ reps.T
    l_pos = np.diagonal(sim, offset=b)
    r_pos = np.diagonal(sim, offset=-b)
    positives = np.concatenate([l_pos, r_pos]).reshape(n, 1)
    mask = (1 - (np.eye(n) + np.eye(n, n, k=-b) + np.eye(n, n, k=b))).astype(bool)
    negatives = sim[mask].reshape(n, -1)
    logits = np.concatenate([positives, negatives], axis=1) / temperature
    m = logits.max(axis=1, keepdims=True)
    lse = np.log(np.exp(logits - m).sum(axis=1, keepdims=True)) + m
    loss = np.sum(lse[:, 0] - logits[:, 0])
    return loss / n


if __name__ == "__main__":
    key = jax.random.PRNGKey(0)

    # (B, D, temperature, use_cosine, operand_dtype, extra kwargs, rtol, atol)
    cases = [
        (4, 32, 0.5, True, jnp.float32, {}, 1e-4, 1e-5),    # padding, single tile
        (8, 32, 0.5, True, jnp.float32, {}, 1e-4, 1e-5),    # exact tiling
        (6, 16, 0.5, False, jnp.float32, {}, 1e-4, 1e-5),   # dot similarity + padding
        (8, 256, 0.5, True, jnp.float32, {"d_block": 128}, 1e-4, 1e-5),   # D-chunked (n_k=2)
        (20, 32, 0.5, True, jnp.float32,
         {"row_block": 16, "col_block": 8}, 1e-4, 1e-5),    # multi row/col tiles + padding
        (16, 64, 0.5, True, jnp.bfloat16, {}, 5e-2, 5e-2),  # bf16 MXU fast path
    ]
    for i, (B, D, temp, cos, odt, kw, rtol, atol) in enumerate(cases):
        k1, k2 = jax.random.split(jax.random.fold_in(key, i))
        zis = jax.random.normal(k1, (B, D), dtype=jnp.float32)
        zjs = jax.random.normal(k2, (B, D), dtype=jnp.float32)

        loss = ntxent_loss(zis, zjs, temperature=temp, use_cosine_similarity=cos,
                           operand_dtype=odt, **kw)
        loss = jax.block_until_ready(loss)

        ref = _ref_ntxent_numpy(np.asarray(zis), np.asarray(zjs), temp, cos)
        np.testing.assert_allclose(np.asarray(loss), ref, rtol=rtol, atol=atol)

    print("KERNEL_OK")
</pallas_src>

<mosaic_0001>
module attributes {stable_mosaic.version = 11 : i64} {
  func.func @_ntxent_kernel(%arg0: i32, %arg1: i32, %arg2: memref<16x32xf32, #tpu.memory_space<vmem>>, %arg3: memref<16x32xf32, #tpu.memory_space<vmem>>, %arg4: memref<16x1xf32, #tpu.memory_space<vmem>>, %arg5: memref<16x1xf32, #tpu.memory_space<vmem>>, %arg6: memref<16x1xf32, #tpu.memory_space<vmem>>, %arg7: memref<16x1xf32, #tpu.memory_space<vmem>>) attributes {dimension_semantics = [#tpu.dimension_semantics<parallel>, #tpu.dimension_semantics<arbitrary>], iteration_bounds = array<i64: 1, 1>, scalar_prefetch = 0 : i64, scratch_operands = 3 : i64, tpu.core_type = #tpu.core_type<tc>, window_params = [{transform_indices = @transform_0, window_bounds = array<i64: 16, 32>}, {transform_indices = @transform_1, window_bounds = array<i64: 16, 32>}, {transform_indices = @transform_2, window_bounds = array<i64: 16, 1>}]} {
    %c0_i32 = arith.constant 0 : i32
    %0 = arith.cmpi eq, %arg1, %c0_i32 : i32
    %c0_i32_0 = arith.constant 0 : i32
    %1 = arith.cmpi eq, %arg1, %c0_i32_0 : i32
    %2 = arith.extui %0 : i1 to i32
    %c0_i32_1 = arith.constant 0 : i32
    %3 = arith.cmpi ne, %2, %c0_i32_1 : i32
    scf.if %3 {
      %cst_36 = arith.constant -1.000000e+30 : f32
      %83 = vector.broadcast %cst_36 : f32 to vector<16x1xf32>
      %c0_37 = arith.constant 0 : index
      %c0_38 = arith.constant 0 : index
      %84 = vector.load %arg5[%c0_37, %c0_38] : memref<16x1xf32, #tpu.memory_space<vmem>>, vector<16x1xf32>
      tpu.vector_store %arg5[%c0_37, %c0_38], %83 {strides = array<i32>} : memref<16x1xf32, #tpu.memory_space<vmem>>, vector<16x1xf32>,
      %cst_39 = arith.constant 0.000000e+00 : f32
      %85 = vector.broadcast %cst_39 : f32 to vector<16x1xf32>
      %c0_40 = arith.constant 0 : index
      %c0_41 = arith.constant 0 : index
      %86 = vector.load %arg6[%c0_40, %c0_41] : memref<16x1xf32, #tpu.memory_space<vmem>>, vector<16x1xf32>
      tpu.vector_store %arg6[%c0_40, %c0_41], %85 {strides = array<i32>} : memref<16x1xf32, #tpu.memory_space<vmem>>, vector<16x1xf32>,
      %cst_42 = arith.constant 0.000000e+00 : f32
      %87 = vector.broadcast %cst_42 : f32 to vector<16x1xf32>
      %c0_43 = arith.constant 0 : index
      %c0_44 = arith.constant 0 : index
      %88 = vector.load %arg7[%c0_43, %c0_44] : memref<16x1xf32, #tpu.memory_space<vmem>>, vector<16x1xf32>
      tpu.vector_store %arg7[%c0_43, %c0_44], %87 {strides = array<i32>} : memref<16x1xf32, #tpu.memory_space<vmem>>, vector<16x1xf32>,
    } else {
    }
    %c0 = arith.constant 0 : index
    %c0_2 = arith.constant 0 : index
    %4 = vector.load %arg2[%c0, %c0_2] : memref<16x32xf32, #tpu.memory_space<vmem>>, vector<16x32xf32>
    %c0_3 = arith.constant 0 : index
    %c0_4 = arith.constant 0 : index
    %5 = vector.load %arg3[%c0_3, %c0_4] : memref<16x32xf32, #tpu.memory_space<vmem>>, vector<16x32xf32>
    %cst = arith.constant dense<0.000000e+00> : vector<16x16xf32>
    %6 = tpu.matmul %4, %5, %cst {dimension_numbers = #tpu.dot_dimension_numbers<[1], [1], [0], [0], [0, 0, 1, 0], [], []>} : vector<16x32xf32>, vector<16x32xf32>, vector<16x16xf32> -> vector<16x16xf32>
    %cst_5 = arith.constant 2.000000e+00 : f32
    %7 = vector.broadcast %cst_5 : f32 to vector<16x16xf32>
    %8 = arith.mulf %6, %7 : vector<16x16xf32>
    %9 = tpu.iota {dimensions = array<i32: 0>} : vector<16x16xi32>
    %c16_i32 = arith.constant 16 : i32
    %10 = arith.muli %arg0, %c16_i32 : i32
    %11 = vector.broadcast %10 : i32 to vector<16x16xi32>
    %12 = arith.addi %9, %11 : vector<16x16xi32>
    %13 = tpu.iota {dimensions = array<i32: 1>} : vector<16x16xi32>
    %c16_i32_6 = arith.constant 16 : i32
    %14 = arith.muli %arg1, %c16_i32_6 : i32
    %15 = vector.broadcast %14 : i32 to vector<16x16xi32>
    %16 = arith.addi %13, %15 : vector<16x16xi32>
    %c8_i32 = arith.constant 8 : i32
    %17 = vector.broadcast %c8_i32 : i32 to vector<16x16xi32>
    %18 = arith.addi %12, %17 : vector<16x16xi32>
    %c16_i32_7 = arith.constant 16 : i32
    %c0_i32_8 = arith.constant 0 : i32
    %19 = arith.cmpi eq, %c16_i32_7, %c0_i32_8 : i32
    %c1_i32 = arith.constant 1 : i32
    %20 = arith.select %19, %c1_i32, %c16_i32_7 : i32
    %21 = vector.broadcast %20 : i32 to vector<16x16xi32>
    %22 = arith.remsi %18, %21 : vector<16x16xi32>
    %c0_i32_9 = arith.constant 0 : i32
    %23 = vector.broadcast %c0_i32_9 : i32 to vector<16x16xi32>
    %24 = arith.cmpi ne, %22, %23 : vector<16x16xi32>
    %c0_i32_10 = arith.constant 0 : i32
    %25 = vector.broadcast %c0_i32_10 : i32 to vector<16x16xi32>
    %26 = arith.cmpi slt, %22, %25 : vector<16x16xi32>
    %c0_i32_11 = arith.constant 0 : i32
    %27 = arith.cmpi slt, %20, %c0_i32_11 : i32
    %28 = vector.broadcast %27 : i1 to vector<16x16xi1>
    %29 = vector.broadcast %28 : vector<16x16xi1> to vector<16x16xi1>
    %30 = arith.xori %26, %29 : vector<16x16xi1>
    %31 = arith.andi %30, %24 : vector<16x16xi1>
    %32 = vector.broadcast %20 : i32 to vector<16x16xi32>
    %33 = arith.addi %22, %32 : vector<16x16xi32>
    %34 = arith.select %31, %33, %22 : vector<16x16xi1>, vector<16x16xi32>
    %c0_12 = arith.constant 0 : index
    %c0_13 = arith.constant 0 : index
    %35 = vector.load %arg7[%c0_12, %c0_13] : memref<16x1xf32, #tpu.memory_space<vmem>>, vector<16x1xf32>
    %36 = arith.cmpi eq, %16, %34 : vector<16x16xi32>
    %cst_14 = arith.constant 0.000000e+00 : f32
    %37 = vector.broadcast %cst_14 : f32 to vector<16x16xf32>
    %38 = arith.select %36, %8, %37 : vector<16x16xi1>, vector<16x16xf32>
    %cst_15 = arith.constant dense<0.000000e+00> : vector<16xf32>
    %39 = vector.multi_reduction <add>, %38, %cst_15 [1] : vector<16x16xf32> to vector<16xf32>
    %40 = vector.shape_cast %39 : vector<16xf32> to vector<16x1xf32>
    %41 = arith.addf %35, %40 : vector<16x1xf32>
    %c0_16 = arith.constant 0 : index
    %c0_17 = arith.constant 0 : index
    %42 = vector.load %arg7[%c0_16, %c0_17] : memref<16x1xf32, #tpu.memory_space<vmem>>, vector<16x1xf32>
    tpu.vector_store %arg7[%c0_16, %c0_17], %41 {strides = array<i32>} : memref<16x1xf32, #tpu.memory_space<vmem>>, vector<16x1xf32>,
    %43 = arith.cmpi eq, %12, %16 : vector<16x16xi32>
    %c8_i32_18 = arith.constant 8 : i32
    %c0_i32_19 = arith.constant 0 : i32
    %44 = arith.cmpi eq, %c8_i32_18, %c0_i32_19 : i32
    %c1_i32_20 = arith.constant 1 : i32
    %45 = arith.select %44, %c1_i32_20, %c8_i32_18 : i32
    %46 = vector.broadcast %45 : i32 to vector<16x16xi32>
    %47 = arith.remsi %16, %46 : vector<16x16xi32>
    %c0_i32_21 = arith.constant 0 : i32
    %48 = vector.broadcast %c0_i32_21 : i32 to vector<16x16xi32>
    %49 = arith.cmpi ne, %47, %48 : vector<16x16xi32>
    %c0_i32_22 = arith.constant 0 : i32
    %50 = vector.broadcast %c0_i32_22 : i32 to vector<16x16xi32>
    %51 = arith.cmpi slt, %47, %50 : vector<16x16xi32>
    %c0_i32_23 = arith.constant 0 : i32
    %52 = arith.cmpi slt, %45, %c0_i32_23 : i32
    %53 = vector.broadcast %52 : i1 to vector<16x16xi1>
    %54 = vector.broadcast %53 : vector<16x16xi1> to vector<16x16xi1>
    %55 = arith.xori %51, %54 : vector<16x16xi1>
    %56 = arith.andi %55, %49 : vector<16x16xi1>
    %57 = vector.broadcast %45 : i32 to vector<16x16xi32>
    %58 = arith.addi %47, %57 : vector<16x16xi32>
    %59 = arith.select %56, %58, %47 : vector<16x16xi1>, vector<16x16xi32>
    %c4_i32 = arith.constant 4 : i32
    %60 = vector.broadcast %c4_i32 : i32 to vector<16x16xi32>
    %61 = arith.cmpi sge, %59, %60 : vector<16x16xi32>
    %62 = arith.ori %43, %61 : vector<16x16xi1>
    %cst_24 = arith.constant -1.000000e+30 : f32
    %63 = vector.broadcast %cst_24 : f32 to vector<16x16xf32>
    %64 = arith.select %62, %63, %8 : vector<16x16xi1>, vector<16x16xf32>
    %c0_25 = arith.constant 0 : index
    %c0_26 = arith.constant 0 : index
    %65 = vector.load %arg5[%c0_25, %c0_26] : memref<16x1xf32, #tpu.memory_space<vmem>>, vector<16x1xf32>
    %cst_27 = arith.constant dense<0xFF800000> : vector<16xf32>
    %66 = vector.multi_reduction <maximumf>, %64, %cst_27 [1] : vector<16x16xf32> to vector<16xf32>
    %67 = vector.shape_cast %66 : vector<16xf32> to vector<16x1xf32>
    %68 = arith.maximumf %65, %67 : vector<16x1xf32>
    %69 = arith.subf %65, %68 : vector<16x1xf32>
    %70 = math.exp %69 : vector<16x1xf32>
    %c0_28 = arith.constant 0 : index
    %c0_29 = arith.constant 0 : index
    %71 = vector.load %arg6[%c0_28, %c0_29] : memref<16x1xf32, #tpu.memory_space<vmem>>, vector<16x1xf32>
    %72 = arith.mulf %70, %71 : vector<16x1xf32>
    %73 = vector.broadcast %68 : vector<16x1xf32> to vector<16x16xf32>
    %74 = arith.subf %64, %73 : vector<16x16xf32>
    %75 = math.exp %74 : vector<16x16xf32>
    %cst_30 = arith.constant dense<0.000000e+00> : vector<16xf32>
    %76 = vector.multi_reduction <add>, %75, %cst_30 [1] : vector<16x16xf32> to vector<16xf32>
    %77 = vector.shape_cast %76 : vector<16xf32> to vector<16x1xf32>
    %78 = arith.addf %72, %77 : vector<16x1xf32>
    %c0_31 = arith.constant 0 : index
    %c0_32 = arith.constant 0 : index
    %79 = vector.load %arg6[%c0_31, %c0_32] : memref<16x1xf32, #tpu.memory_space<vmem>>, vector<16x1xf32>
    tpu.vector_store %arg6[%c0_31, %c0_32], %78 {strides = array<i32>} : memref<16x1xf32, #tpu.memory_space<vmem>>, vector<16x1xf32>,
    %c0_33 = arith.constant 0 : index
    %c0_34 = arith.constant 0 : index
    %80 = vector.load %arg5[%c0_33, %c0_34] : memref<16x1xf32, #tpu.memory_space<vmem>>, vector<16x1xf32>
    tpu.vector_store %arg5[%c0_33, %c0_34], %68 {strides = array<i32>} : memref<16x1xf32, #tpu.memory_space<vmem>>, vector<16x1xf32>,
    %81 = arith.extui %1 : i1 to i32
    %c0_i32_35 = arith.constant 0 : i32
    %82 = arith.cmpi ne, %81, %c0_i32_35 : i32
    scf.if %82 {
      %c0_36 = arith.constant 0 : index
      %c0_37 = arith.constant 0 : index
      %83 = vector.load %arg5[%c0_36, %c0_37] : memref<16x1xf32, #tpu.memory_space<vmem>>, vector<16x1xf32>
      %c0_38 = arith.constant 0 : index
      %c0_39 = arith.constant 0 : index
      %84 = vector.load %arg6[%c0_38, %c0_39] : memref<16x1xf32, #tpu.memory_space<vmem>>, vector<16x1xf32>
      %85 = math.log %84 : vector<16x1xf32>
      %86 = arith.addf %83, %85 : vector<16x1xf32>
      %c0_40 = arith.constant 0 : index
      %c0_41 = arith.constant 0 : index
      %87 = vector.load %arg7[%c0_40, %c0_41] : memref<16x1xf32, #tpu.memory_space<vmem>>, vector<16x1xf32>
      %88 = arith.subf %86, %87 : vector<16x1xf32>
      %89 = tpu.iota {dimensions = array<i32: 0>} : vector<16x1xi32>
      %c16_i32_42 = arith.constant 16 : i32
      %90 = arith.muli %arg0, %c16_i32_42 : i32
      %91 = vector.broadcast %90 : i32 to vector<16x1xi32>
      %92 = arith.addi %89, %91 : vector<16x1xi32>
      %c8_i32_43 = arith.constant 8 : i32
      %c0_i32_44 = arith.constant 0 : i32
      %93 = arith.cmpi eq, %c8_i32_43, %c0_i32_44 : i32
      %c1_i32_45 = arith.constant 1 : i32
      %94 = arith.select %93, %c1_i32_45, %c8_i32_43 : i32
      %95 = vector.broadcast %94 : i32 to vector<16x1xi32>
      %96 = arith.remsi %92, %95 : vector<16x1xi32>
      %c0_i32_46 = arith.constant 0 : i32
      %97 = vector.broadcast %c0_i32_46 : i32 to vector<16x1xi32>
      %98 = arith.cmpi ne, %96, %97 : vector<16x1xi32>
      %c0_i32_47 = arith.constant 0 : i32
      %99 = vector.broadcast %c0_i32_47 : i32 to vector<16x1xi32>
      %100 = arith.cmpi slt, %96, %99 : vector<16x1xi32>
      %c0_i32_48 = arith.constant 0 : i32
      %101 = arith.cmpi slt, %94, %c0_i32_48 : i32
      %102 = vector.broadcast %101 : i1 to vector<16x1xi1>
      %103 = vector.broadcast %102 : vector<16x1xi1> to vector<16x1xi1>
      %104 = arith.xori %100, %103 : vector<16x1xi1>
      %105 = arith.andi %104, %98 : vector<16x1xi1>
      %106 = vector.broadcast %94 : i32 to vector<16x1xi32>
      %107 = arith.addi %96, %106 : vector<16x1xi32>
      %108 = arith.select %105, %107, %96 : vector<16x1xi1>, vector<16x1xi32>
      %c4_i32_49 = arith.constant 4 : i32
      %109 = vector.broadcast %c4_i32_49 : i32 to vector<16x1xi32>
      %110 = arith.cmpi slt, %108, %109 : vector<16x1xi32>
      %cst_50 = arith.constant 0.000000e+00 : f32
      %111 = vector.broadcast %cst_50 : f32 to vector<16x1xf32>
      %112 = arith.select %110, %88, %111 : vector<16x1xi1>, vector<16x1xf32>
      %c0_51 = arith.constant 0 : index
      %c0_52 = arith.constant 0 : index
      %113 = vector.load %arg4[%c0_51, %c0_52] : memref<16x1xf32, #tpu.memory_space<vmem>>, vector<16x1xf32>
      tpu.vector_store %arg4[%c0_51, %c0_52], %112 {strides = array<i32>} : memref<16x1xf32, #tpu.memory_space<vmem>>, vector<16x1xf32>,
    } else {
    }
    return
  }
  func.func @transform_0(%arg0: i32, %arg1: i32) -> (i32, i32) {
    %c0_i32 = arith.constant 0 : i32
    %c0_i32_0 = arith.constant 0 : i32
    return %arg0, %c0_i32 : i32, i32
  }
  func.func @transform_1(%arg0: i32, %arg1: i32) -> (i32, i32) {
    %c0_i32 = arith.constant 0 : i32
    %c0_i32_0 = arith.constant 0 : i32
    return %arg1, %c0_i32 : i32, i32
  }
  func.func @transform_2(%arg0: i32, %arg1: i32) -> (i32, i32) {
    %c0_i32 = arith.constant 0 : i32
    %c0_i32_0 = arith.constant 0 : i32
    return %arg0, %c0_i32 : i32, i32
  }
}

</mosaic_0001>

<bundles_post_ra>
// kernel: tpu_custom_call.1
= control target key start
LH: loop header
LB: loop body
LE: loop exit
PB: predicated region body
PF: predicated region fallthrough
CT: control target
= control target key end

     0   :  { %7 = vsyncpa [#allocation6], 0  ;;  %s477_s0 = inlined_call_operand.hbm [shape: f32[16,32], index: 0, kind: input, shape index: {}]   ;;  %s478_s1 = inlined_call_operand.hbm [shape: f32[16,32], index: 1, kind: input, shape index: {}]   ;;  %s479_s2 = inlined_call_operand.vmem [shape: f32[16,1], index: 2, kind: output, shape index: {}]  }
   0x1   :  { %8 = vsyncpa [#allocation8], 0  ;;  %s400_s9 = smov [#allocation5]  }
   0x2   :  { %s14_s10 = sshll.u32 %s400_s9, 4  ;;  %s15_s10 = int_to_ptr.vmem [resolvable:$true] %s14_s10 }
   0x3   :  { %s364_s11 = scalar_lea.vmem %s15_s10, 256  ;;  %p369_p1 = scmp.lt.s32.totalorder %s15_s10, %s15_s10 }
   0x4   :  { %p365_p0 = scmp.ne.s32.totalorder %s15_s10, %s364_s11  ;;  %p370_p2 = scmp.lt.s32.totalorder %s364_s11, %s364_s11 }
   0x6   :  { %p371_p3 = por %p370_p2, %p369_p1 }
   0x8   :  { %p372_p4 = pnand %p371_p3, %p365_p0 }
   0xa   :  { %375 = shalt.err (!%p372_p4)
}
   0xb   :  { %s401_s12 = smov 128   ;;  %s402_s13 = smov 8  }
   0xc   :  { %20 = dma.hbm_to_vmem [thread:$0]  %s477_s0, 256, %s15_s10, [#allocation6], %s401_s12, %s401_s12, %s402_s13  }
   0xd   :  { %s403_s16 = smov [#allocation7]  }
   0xe   :  { %s26_s17 = sshll.u32 %s403_s16, 4  ;;  %s27_s17 = int_to_ptr.vmem [resolvable:$true] %s26_s17 }
   0xf   :  { %s384_s18 = scalar_lea.vmem %s27_s17, 256  ;;  %p389_p6 = scmp.lt.s32.totalorder %s27_s17, %s27_s17 }
  0x10   :  { %p385_p5 = scmp.ne.s32.totalorder %s27_s17, %s384_s18  ;;  %p390_p7 = scmp.lt.s32.totalorder %s384_s18, %s384_s18 }
  0x12   :  { %p391_p8 = por %p390_p7, %p389_p6 }
  0x14   :  { %p392_p9 = pnand %p391_p8, %p385_p5 }
  0x16   :  { %395 = shalt.err (!%p392_p9)
}
  0x17   :  { %32 = dma.hbm_to_vmem [thread:$0]  %s478_s1, 256, %s27_s17, [#allocation8], %s401_s12, %s401_s12, %s402_s13  }
  0x18   :  { %396 = dma.done.wait [#allocation6], 256  }
  0x19   :  { %397 = vsyncadd [#allocation6], 4294967040 }
  0x1a   :  { %398 = dma.done.wait [#allocation8], 256  }
  0x1b   :  { %399 = vsyncadd [#allocation8], 4294967040  ;;  %vm54_vm0 = vcmask 261120   ;;  %v53_v0 = vld [vmem:[#allocation7 + $0x8] sm:$0xff]  ;;  %v52_v1 = vld [vmem:[#allocation7] sm:$0xff]  ;;  %v144_v4 = vlaneseq  ;;  %vm43_vm3 = vcmask 7168  }
  0x1c   :  { %v50_v2 = vld [vmem:[#allocation5] sm:$0xff]  ;;  %328 = vmatprep.subr.msk.mxu0 %vm54_vm0, %v53_v0  ;;  %v51_v3 = vld [vmem:[#allocation5 + $0x8] sm:$0xff]  ;;  %v404_v13 = vmov -1e+30   ;;  %vm188_vm9 = vcmask 130048   ;;  %v405_v25 = vmov 0  }
  0x1d   :  { %332 = vmatprep.mubr.msk.f32.mxu0 %vm54_vm0, %v50_v2  ;;  %329 = vmatpush3.xpose.msk.msra.mxu0 %vm54_vm0, %v53_v0  ;;  %v428_v5 = vshrl.u32 %v144_v4, 7  ;;  %v152_v8 = vand.u32 127, %v144_v4  ;;  %44 = vst.msk [vmem:[#allocation2] sm:$0xff] %vm43_vm3, %v404_v13  ;;  %45 = vst.msk [vmem:[#allocation2 + $0x8] sm:$0xff] %vm43_vm3, %v404_v13  ;;  %v406_v26 = vmov 0.0  }
  0x1e   :  { %330 = vmatprep.subr.msk.mxu0 %vm54_vm0, %v52_v1  ;;  %342 = vset.pattern.permute.xlu1 %v405_v25  ;;  %46 = vst.msk [vmem:[#allocation3] sm:$0xff] %vm43_vm3, %v406_v26  ;;  %47 = vst.msk [vmem:[#allocation3 + $0x8] sm:$0xff] %vm43_vm3, %v406_v26 }
  0x1f   :  { %v431_v6 = vadd.s32 8, %v428_v5  ;;  %v206_v14 = vand.u32 7, %v152_v8  ;;  %vm200_vm4 = vcmp.eq.s32.totalorder %v428_v5, %v152_v8  ;;  %343 = vset.pattern.permute.xlu0 %v405_v25  ;;  %48 = vst.msk [vmem:[#allocation4] sm:$0xff] %vm43_vm3, %v406_v26  ;;  %49 = vst.msk [vmem:[#allocation4 + $0x8] sm:$0xff] %vm43_vm3, %v406_v26  ;;  %v288_v4 = vand.u32 7, %v428_v5 }
  0x21   :  { %331 = vmatpush3.xpose.msk.msra.mxu0 %vm54_vm0, %v52_v1  ;;  %v157_v7 = vadd.s32 8, %v431_v6  ;;  %v162_v10 = vand.u32 15, %v431_v6  ;;  %vm214_vm5 = vcmp.ge.s32.totalorder %v206_v14, 4  ;;  %vm201_vm6 = vcmp.eq.s32.totalorder %v431_v6, %v152_v8 }
  0x22   :  { %vm215_vm7 = vmor %vm200_vm4, %vm214_vm5  ;;  %vm308_vm10 = vcmp.lt.s32.totalorder %v288_v4, 4  ;;  %v295_v11 = vand.u32 7, %v431_v6 }
  0x23   :  { %v169_v9 = vand.u32 15, %v157_v7  ;;  %vm439_vm2 = vcmp.eq.s32.totalorder %v152_v8, %v162_v10  ;;  %vm216_vm8 = vmor %vm201_vm6, %vm214_vm5 }
  0x24   :  { %333 = vmatmul.mubr.msk.f32.vlgmr.msra.gmra.mxu0 %vm54_vm0, %v51_v3  ;;  %v219_v27 = vld [vmem:[#allocation2] sm:$0xff]  ;;  %v220_v30 = vld [vmem:[#allocation2 + $0x8] sm:$0xff]  ;;  %vm309_vm11 = vcmp.lt.s32.totalorder %v295_v11, 4 }
  0x25   :  { %vm435_vm1 = vcmp.eq.s32.totalorder %v152_v8, %v169_v9  ;;  %v235_v50 = vld [vmem:[#allocation3] sm:$0xff]  ;;  %v236_v54 = vld [vmem:[#allocation3 + $0x8] sm:$0xff] }
  0x26   :  { %v182_v56 = vld [vmem:[#allocation4] sm:$0xff]  ;;  %v183_v62 = vld [vmem:[#allocation4 + $0x8] sm:$0xff] }
  0xe4   :  { %v334_v15 = vpop.f32.mrf.mxu0 }
  0xe5   :  { %v143_v16 = vmul.f32 2.0, %v334_v15 }
  0xe6   :  { %v133_v17 = vpop.f32.mrf.mxu0 }
  0xe7   :  { %v142_v18 = vmul.f32 2.0, %v133_v17  ;;  %v187_v19 = vsel %vm435_vm1, %v143_v16, 0.0  ;;  %v218_v23 = vsel %vm216_vm8, -1e+30, %v143_v16 }
  0xe8   :  { %v224_v24 = vsel %vm188_vm9, %v218_v23, -inf  ;;  %v192_v46 = vsel %vm188_vm9, %v187_v19, 0.0 }
  0xe9   :  { %v217_v20 = vsel %vm215_vm7, -1e+30, %v142_v18  ;;  %v186_v21 = vsel %vm439_vm2, %v142_v18, 0.0 }
  0xea   :  { %v221_v22 = vsel %vm188_vm9, %v217_v20, -inf  ;;  %v189_v44 = vsel %vm188_vm9, %v186_v21, 0.0 }
  0xeb   :  { %222 = vmax.xlane.f32.xlu0 %v221_v22 }
  0xef   :  { %225 = vmax.xlane.f32.xlu0 %v224_v24 }
 0x174   :  { %v223_v28 = vpop.xlane.xlu0 %222 }
 0x175   :  { %v227_v29 = vmax.f32 %v219_v27, %v223_v28 }
 0x177   :  { %v229_v31 = vsub.f32 %v219_v27, %v227_v29  ;;  %265 = vst.msk [vmem:[#allocation2] sm:$0xff] %vm43_vm3, %v227_v29  ;;  %241 = vperm.xlu1 %342, %v227_v29  }
 0x178   :  { %v226_v32 = vpop.xlane.xlu0 %225 }
 0x179   :  { %v228_v33 = vmax.f32 %v220_v30, %v226_v32  ;;  %v231_v47 = vmul.f32 1.442695, %v229_v31 }
 0x17b   :  { %v230_v34 = vsub.f32 %v220_v30, %v228_v33  ;;  %266 = vst.msk [vmem:[#allocation2 + $0x8] sm:$0xff] %vm43_vm3, %v228_v33  ;;  %246 = vperm.xlu1 %342, %v228_v33  }
 0x17d   :  { %v233_v48 = vmul.f32 1.442695, %v230_v34 }
 0x17e   :  { %v270_v8 = vld [vmem:[#allocation2] sm:$0xff] }
 0x182   :  { %v271_v15 = vld [vmem:[#allocation2 + $0x8] sm:$0xff] }
 0x1f2   :  { %v242_v35 = vpop.permute.xlu1 %241 }
 0x1f3   :  { %v249_v36 = vsub.f32 %v217_v20, %v242_v35 }
 0x1f5   :  { %v251_v37 = vmul.f32 1.442695, %v249_v36 }
 0x1f6   :  { %v247_v38 = vpop.permute.xlu1 %246 }
 0x1f7   :  { %344 = vpow2.f32 %v251_v37  ;;  %v250_v39 = vsub.f32 %v218_v23, %v247_v38 }
 0x1f9   :  { %v253_v40 = vmul.f32 1.442695, %v250_v39 }
 0x1fb   :  { %346 = vpow2.f32 %v253_v40 }
 0x1fc   :  { %348 = vpow2.f32 %v231_v47 }
 0x1fd   :  { %350 = vpow2.f32 %v233_v48 }
 0x204   :  { %v345_v41 = vpop.eup %344 }
 0x205   :  { %v255_v42 = vsel %vm188_vm9, %v345_v41, 0.0 }
 0x206   :  { %256 = vadd.xlane.f32.xlu0 %v255_v42 }
 0x208   :  { %v347_v43 = vpop.eup %346 }
 0x209   :  { %v258_v45 = vsel %vm188_vm9, %v347_v43, 0.0  ;;  %v349_v49 = vpop.eup %348 }
 0x20a   :  { %190 = vadd.xlane.f32.xlu0 %v189_v44  ;;  %259 = vadd.xlane.f32.xlu1 %v258_v45  ;;  %v237_v51 = vmul.f32 %v349_v49, %v235_v50  ;;  %v351_v52 = vpop.eup %350 }
 0x20b   :  { %v238_v57 = vmul.f32 %v351_v52, %v236_v54 }
 0x20e   :  { %193 = vadd.xlane.f32.xlu0 %v192_v46 }
 0x28f   :  { %v257_v53 = vpop.xlane.xlu0 %256 }
 0x290   :  { %v261_v55 = vadd.f32 %v257_v53, %v237_v51 }
 0x292   :  { %263 = vst.msk [vmem:[#allocation3] sm:$0xff] %vm43_vm3, %v261_v55 }
 0x293   :  { %v191_v58 = vpop.xlane.xlu0 %190  ;;  %v260_v59 = vpop.xlane.xlu1 %259 }
 0x294   :  { %v195_v60 = vadd.f32 %v191_v58, %v182_v56  ;;  %v262_v61 = vadd.f32 %v260_v59, %v238_v57 }
 0x296   :  { %198 = vst.msk [vmem:[#allocation4] sm:$0xff] %vm43_vm3, %v195_v60  ;;  %264 = vst.msk [vmem:[#allocation3 + $0x8] sm:$0xff] %vm43_vm3, %v262_v61 }
 0x297   :  { %v194_v63 = vpop.xlane.xlu0 %193 }
 0x298   :  { %v196_v0 = vadd.f32 %v194_v63, %v183_v62 }
 0x299   :  { %v272_v1 = vld [vmem:[#allocation3] sm:$0xff] }
 0x29a   :  { %352 = vlog2.f32 %v272_v1  ;;  %199 = vst.msk [vmem:[#allocation4 + $0x8] sm:$0xff] %vm43_vm3, %v196_v0 }
 0x29d   :  { %v273_v2 = vld [vmem:[#allocation3 + $0x8] sm:$0xff]  ;;  %v280_v12 = vld [vmem:[#allocation4] sm:$0xff] }
 0x29e   :  { %354 = vlog2.f32 %v273_v2 }
 0x2a1   :  { %v281_v5 = vld [vmem:[#allocation4 + $0x8] sm:$0xff] }
 0x2a7   :  { %v353_v3 = vpop.eup %352 }
 0x2a8   :  { %v275_v7 = vmul.f32 0.6931472, %v353_v3 }
 0x2aa   :  { %v278_v9 = vadd.f32 %v275_v7, %v270_v8 }
 0x2ab   :  { %v355_v10 = vpop.eup %354 }
 0x2ac   :  { %v282_v13 = vsub.f32 %v278_v9, %v280_v12  ;;  %v277_v14 = vmul.f32 0.6931472, %v355_v10 }
 0x2ae   :  { %v310_v16 = vsel %vm308_vm10, %v282_v13, 0.0  ;;  %v279_v17 = vadd.f32 %v277_v14, %v271_v15 }
 0x2af   :  { %312 = vst.msk [vmem:[%s479_s2] sm:$0xff] %vm43_vm3, %v310_v16 }
 0x2b0   :  { %v283_v18 = vsub.f32 %v279_v17, %v281_v5 }
 0x2b2   :  { %v311_v19 = vsel %vm309_vm11, %v283_v18, 0.0 }
 0x2b3   :  { %313 = vst.msk [vmem:[%s479_s2 + $0x8] sm:$0xff] %vm43_vm3, %v311_v19 }
 0x2b4   :  { %318 = vsyncpa [#allocation6], 1 }
 0x2b5   :  { %319 = vsyncpa [#allocation8], 1 }

</bundles_post_ra>
